<compile_context>
chip_gen: v6e
topology: v6e:2x2x1
jax: 0.10.0
libtpu: 0.0.40
codegen_flags: <defaults>
</compile_context>

<pallas_src>
import numpy as np
import jax
import jax.numpy as jnp
from jax import lax
from jax.experimental import pallas as pl
from jax.experimental.pallas import tpu as pltpu


def _round_up(x, m):
    return ((x + m - 1) // m) * m


# ----------------------------------------------------------------------------
# Weight-only path: reconstruct the dense (voc_size, emb_size) table from the
# TT cores.  Hoisted out of the per-call hot path (cache / reuse across calls).
# Stored in bf16 by default (exact values are what the gather kernel returns).
# ----------------------------------------------------------------------------
def tt_full_dense(cores, dtype=jnp.bfloat16):
    d = len(cores)
    ranks = [c.shape[0] for c in cores] + [cores[-1].shape[-1]]
    voc_quant = [c.shape[1] for c in cores]
    emb_quant = [c.shape[2] for c in cores]

    res = cores[0].reshape(-1, ranks[1])
    for k in range(1, d):
        res = res.reshape(-1, ranks[k]) @ cores[k].reshape(ranks[k], -1)

    inter = []
    for k in range(d):
        inter += [voc_quant[k], emb_quant[k]]
    perm = list(range(0, 2 * d, 2)) + list(range(1, 2 * d, 2))
    voc_size = int(np.prod(voc_quant))
    emb_size = int(np.prod(emb_quant))
    full = jnp.transpose(res.reshape(inter), perm).reshape(voc_size, emb_size)
    return full.astype(dtype)


# ----------------------------------------------------------------------------
# Pallas kernel: K-tiled one-hot MXU gather of a block of embedding rows.
#   idx_ref : (BLK, 1)   int32    indices for this row block (invariant in kb)
#   full_ref: (TK, emb)  bfloat16 table K tile (streamed HBM->VMEM per kb)
#   out_ref : (BLK, emb) float32  gathered (and padding-masked) rows
#   acc_ref : (BLK, emb) float32  VMEM accumulator across K tiles
# ----------------------------------------------------------------------------
def _make_gather_kernel(blk, tk, padding_idx):
    def kernel(idx_ref, full_ref, out_ref, acc_ref):
        kb = pl.program_id(1)

        @pl.when(kb == 0)
        def _():
            acc_ref[...] = jnp.zeros_like(acc_ref)

        idx = idx_ref[...]                                        # (blk, 1) int32
        pos = kb * tk + lax.broadcasted_iota(jnp.int32, (blk, tk), 1)
        hit = pos == idx                                          # (blk, tk) bool
        if padding_idx is not None:
            # Mask the compare (not the table row) so padding rows -> all-miss one-hot.
            hit = jnp.logical_and(hit, idx != padding_idx)
        # 0/1 is exact in bf16; bf16 x bf16 runs at native MXU rate, accumulate in f32.
        one_hot = hit.astype(jnp.bfloat16)
        acc_ref[...] += jnp.dot(one_hot, full_ref[...],
                                preferred_element_type=jnp.float32)

        @pl.when(kb == pl.num_programs(1) - 1)
        def _():
            out_ref[...] = acc_ref[...].astype(out_ref.dtype)

    return kernel


def tt_embedding_gather(full, idx_flat, padding_idx=None,
                        block_rows=1024, voc_tile=512):
    voc_size, emb_size = full.shape
    full = full.astype(jnp.bfloat16)
    n = int(idx_flat.shape[0])
    assert block_rows % 8 == 0, "block_rows must be sublane (8) aligned"

    # Row block: as big as the input allows (amortizes ~0.35us/grid-step), but keep the
    # "parallel" row axis with >=2 steps whenever the input can be split (v7x has 2 TCs
    # and only parallel axes shard across them).
    blk = min(block_rows, _round_up(n, 8))
    if n > 8 and _round_up(n, blk) // blk < 2:
        blk = max(8, _round_up((n + 1) // 2, 8))
    n_pad = _round_up(n, blk)

    # voc (K) tile: reduction axis, streamed HBM->VMEM, accumulated in f32 scratch.
    tk = min(_round_up(voc_size, 8), voc_tile)
    voc_pad = _round_up(voc_size, tk)
    if voc_pad != voc_size:
        # Zero rows are never selected (indices < voc_size) and contribute nothing.
        full = jnp.pad(full, ((0, voc_pad - voc_size), (0, 0)))

    idx2 = idx_flat.astype(jnp.int32).reshape(n, 1)
    if n_pad != n:
        # Out-of-range sentinel -> all-miss one-hot -> tail rows stay exactly zero.
        idx2 = jnp.pad(idx2, ((0, n_pad - n), (0, 0)), constant_values=voc_size)

    # Explicit VMEM budget: 2x bf16 table tile + 2x idx block + 2x f32 out block
    # + f32 accumulator, with headroom.  Stays far below v7x's 64 MiB.
    vmem_bytes = (2 * tk * emb_size * 2        # table tile, double-buffered, bf16
                  + 2 * blk * 4                # idx block, double-buffered
                  + 2 * blk * emb_size * 4     # out block, double-buffered
                  + blk * emb_size * 4)        # accumulator
    vmem_limit = int(min(max(2 * vmem_bytes, 16 * 1024 * 1024), 64 * 1024 * 1024))

    out = pl.pallas_call(
        _make_gather_kernel(blk, tk, padding_idx),
        out_shape=jax.ShapeDtypeStruct((n_pad, emb_size), jnp.float32),
        grid=(n_pad // blk, voc_pad // tk),
        in_specs=[
            pl.BlockSpec((blk, 1), lambda nb, kb: (nb, 0)),         # idx (kb-invariant)
            pl.BlockSpec((tk, emb_size), lambda nb, kb: (kb, 0)),   # table K tile
        ],
        out_specs=pl.BlockSpec((blk, emb_size), lambda nb, kb: (nb, 0)),
        scratch_shapes=[pltpu.VMEM((blk, emb_size), jnp.float32)],
        compiler_params=pltpu.CompilerParams(
            dimension_semantics=("parallel", "arbitrary"),
            vmem_limit_bytes=vmem_limit),
    )(idx2, full)

    if n_pad != n:
        # TODO(synk): let the consumer slice lazily (or mask the ragged tail in-kernel)
        # to avoid this extra copy pass when n is not a multiple of blk.
        out = out[:n]
    return out


def tt_embedding_forward(x, cores, padding_idx=None, block_rows=1024,
                         voc_tile=512, full=None):
    """Forward pass of TTEmbedding.  Pass a precomputed bf16 `full` table to reuse it
    across calls (it depends only on the weights)."""
    if full is None:
        full = tt_full_dense(cores)
    emb_size = full.shape[1]
    rows = tt_embedding_gather(full, x.reshape(-1), padding_idx,
                               block_rows, voc_tile)
    return rows.reshape(*x.shape, emb_size)


# ----------------------------------------------------------------------------
# Deterministic glorot-style TT core initialization (mimics t3.glorot_initializer)
# ----------------------------------------------------------------------------
def init_tt_cores(key, voc_quant, emb_quant, tt_rank):
    d = len(voc_quant)
    ranks = [1] + [tt_rank] * (d - 1) + [1]
    voc_size = int(np.prod(voc_quant))
    emb_size = int(np.prod(emb_quant))
    lamb = 2.0 / (voc_size + emb_size)
    cr_exp = -1.0 / (2 * d)
    var = float(np.prod(np.array(ranks, dtype=np.float64) ** cr_exp))
    core_std = (np.sqrt(lamb) ** (1.0 / d)) * var
    cores = []
    for k in range(d):
        key, sub = jax.random.split(key)
        cores.append(core_std * jax.random.normal(
            sub, (ranks[k], voc_quant[k], emb_quant[k], ranks[k + 1]),
            dtype=jnp.float32))
    return cores


# ----------------------------------------------------------------------------
# Pure-JAX reference (f32 table) for correctness check
# ----------------------------------------------------------------------------
def reference_forward(x, cores, padding_idx=None, table_dtype=jnp.float32):
    d = len(cores)
    voc_quant = [c.shape[1] for c in cores]
    emb_quant = [c.shape[2] for c in cores]
    res = cores[0].reshape(-1, cores[0].shape[-1])
    for k in range(1, d):
        res = res.reshape(-1, cores[k].shape[0]) @ cores[k].reshape(
            cores[k].shape[0], -1)
    inter = []
    for k in range(d):
        inter += [voc_quant[k], emb_quant[k]]
    perm = list(range(0, 2 * d, 2)) + list(range(1, 2 * d, 2))
    full = jnp.transpose(res.reshape(inter), perm).reshape(
        int(np.prod(voc_quant)), int(np.prod(emb_quant)))
    full = full.astype(table_dtype).astype(jnp.float32)
    xf = x.reshape(-1)
    rows = full[xf]
    if padding_idx is not None:
        rows = jnp.where((xf != padding_idx)[:, None], rows, 0.0)
    return rows.reshape(*x.shape, full.shape[1])


if __name__ == "__main__":
    # TTEmbedding config: d=3, tt_rank=8, shape=[[4,4,4],[4,4,8]]
    voc_quant = (4, 4, 4)     # voc_size = 64
    emb_quant = (4, 4, 8)     # emb_size = 128
    tt_rank = 8
    padding_idx = 3

    key = jax.random.PRNGKey(0)
    k_cores, k_x = jax.random.split(key)
    cores = init_tt_cores(k_cores, voc_quant, emb_quant, tt_rank)

    batch, seq = 2, 8
    voc_size = int(np.prod(voc_quant))
    emb_size = int(np.prod(emb_quant))
    x = jax.random.randint(k_x, (batch, seq), 0, voc_size, dtype=jnp.int32)
    x = x.at[0, 0].set(padding_idx)   # exercise padding_idx masking

    # References: exact (against the bf16-quantized table the kernel gathers from)
    # and approximate (against the f32 table, semantics sanity check).
    ref_exact = reference_forward(x, cores, padding_idx=padding_idx,
                                  table_dtype=jnp.bfloat16)
    ref_f32 = reference_forward(x, cores, padding_idx=padding_idx,
                                table_dtype=jnp.float32)

    # 1) Default path (jitted; row axis auto-split into 2 parallel blocks here).
    fwd = jax.jit(tt_embedding_forward,
                  static_argnames=("padding_idx", "block_rows", "voc_tile"))
    out = fwd(x, cores, padding_idx=padding_idx)
    out = jax.block_until_ready(out)
    assert out.shape == (batch, seq, emb_size)
    assert np.allclose(np.asarray(out), np.asarray(ref_exact), rtol=0, atol=1e-6)
    assert np.allclose(np.asarray(out), np.asarray(ref_f32), rtol=2e-2, atol=1e-3)
    assert np.allclose(np.asarray(out[0, 0]), 0.0)   # padded row zeroed

    # 2) Hoisted (cached) bf16 table + small tiles: exercises multi-step row grid,
    #    multiple K tiles, and the pl.when init/finalize accumulation path.
    full_cached = jax.jit(tt_full_dense)(cores)
    out2 = tt_embedding_forward(x, cores, padding_idx=padding_idx,
                                block_rows=8, voc_tile=16, full=full_cached)
    out2 = jax.block_until_ready(out2)
    assert np.allclose(np.asarray(out2), np.asarray(ref_exact), rtol=0, atol=1e-6)

    print("KERNEL_OK")
</pallas_src>

<mosaic_0001>
module attributes {stable_mosaic.version = 11 : i64} {
  func.func @kernel(%arg0: i32, %arg1: i32, %arg2: memref<8x1xi32, #tpu.memory_space<vmem>>, %arg3: memref<64x128xbf16, #tpu.memory_space<vmem>>, %arg4: memref<8x128xf32, #tpu.memory_space<vmem>>, %arg5: memref<8x128xf32, #tpu.memory_space<vmem>>) attributes {dimension_semantics = [#tpu.dimension_semantics<parallel>, #tpu.dimension_semantics<arbitrary>], iteration_bounds = array<i64: 2, 1>, scalar_prefetch = 0 : i64, scratch_operands = 1 : i64, tpu.core_type = #tpu.core_type<tc>, window_params = [{transform_indices = @transform_0, window_bounds = array<i64: 8, 1>}, {transform_indices = @transform_1, window_bounds = array<i64: 64, 128>}, {transform_indices = @transform_2, window_bounds = array<i64: 8, 128>}]} {
    %c0_i32 = arith.constant 0 : i32
    %0 = arith.cmpi eq, %arg1, %c0_i32 : i32
    %1 = arith.extui %0 : i1 to i32
    %c0_i32_0 = arith.constant 0 : i32
    %2 = arith.cmpi ne, %1, %c0_i32_0 : i32
    scf.if %2 {
      %cst_10 = arith.constant 0.000000e+00 : f32
      %25 = vector.broadcast %cst_10 : f32 to vector<8x128xf32>
      %c0_11 = arith.constant 0 : index
      %c0_12 = arith.constant 0 : index
      %26 = vector.load %arg5[%c0_11, %c0_12] : memref<8x128xf32, #tpu.memory_space<vmem>>, vector<8x128xf32>
      tpu.vector_store %arg5[%c0_11, %c0_12], %25 {strides = array<i32>} : memref<8x128xf32, #tpu.memory_space<vmem>>, vector<8x128xf32>,
    } else {
    }
    %c0 = arith.constant 0 : index
    %c0_1 = arith.constant 0 : index
    %3 = vector.load %arg2[%c0, %c0_1] : memref<8x1xi32, #tpu.memory_space<vmem>>, vector<8x1xi32>
    %c64_i32 = arith.constant 64 : i32
    %4 = arith.muli %arg1, %c64_i32 : i32
    %5 = tpu.iota {dimensions = array<i32: 1>} : vector<8x64xi32>
    %6 = vector.broadcast %4 : i32 to vector<8x64xi32>
    %7 = arith.addi %6, %5 : vector<8x64xi32>
    %8 = vector.broadcast %3 : vector<8x1xi32> to vector<8x64xi32>
    %9 = arith.cmpi eq, %7, %8 : vector<8x64xi32>
    %c3_i32 = arith.constant 3 : i32
    %10 = vector.broadcast %c3_i32 : i32 to vector<8x1xi32>
    %11 = arith.cmpi ne, %3, %10 : vector<8x1xi32>
    %12 = vector.broadcast %11 : vector<8x1xi1> to vector<8x64xi1>
    %13 = arith.andi %9, %12 : vector<8x64xi1>
    %14 = arith.extui %13 : vector<8x64xi1> to vector<8x64xi32>
    %15 = arith.sitofp %14 : vector<8x64xi32> to vector<8x64xf32>
    %16 = arith.truncf %15 : vector<8x64xf32> to vector<8x64xbf16>
    %c0_2 = arith.constant 0 : index
    %c0_3 = arith.constant 0 : index
    %17 = vector.load %arg5[%c0_2, %c0_3] : memref<8x128xf32, #tpu.memory_space<vmem>>, vector<8x128xf32>
    %c0_4 = arith.constant 0 : index
    %c0_5 = arith.constant 0 : index
    %18 = vector.load %arg3[%c0_4, %c0_5] : memref<64x128xbf16, #tpu.memory_space<vmem>>, vector<64x128xbf16>
    %cst = arith.constant dense<0.000000e+00> : vector<8x128xf32>
    %19 = tpu.matmul %16, %18, %cst {dimension_numbers = #tpu.dot_dimension_numbers<[1], [0], [0], [1], [0, 0, 1, 1], [], []>} : vector<8x64xbf16>, vector<64x128xbf16>, vector<8x128xf32> -> vector<8x128xf32>
    %20 = arith.addf %17, %19 : vector<8x128xf32>
    %c0_6 = arith.constant 0 : index
    %c0_7 = arith.constant 0 : index
    %21 = vector.load %arg5[%c0_6, %c0_7] : memref<8x128xf32, #tpu.memory_space<vmem>>, vector<8x128xf32>
    tpu.vector_store %arg5[%c0_6, %c0_7], %20 {strides = array<i32>} : memref<8x128xf32, #tpu.memory_space<vmem>>, vector<8x128xf32>,
    %c0_i32_8 = arith.constant 0 : i32
    %22 = arith.cmpi eq, %arg1, %c0_i32_8 : i32
    %23 = arith.extui %22 : i1 to i32
    %c0_i32_9 = arith.constant 0 : i32
    %24 = arith.cmpi ne, %23, %c0_i32_9 : i32
    scf.if %24 {
      %c0_10 = arith.constant 0 : index
      %c0_11 = arith.constant 0 : index
      %25 = vector.load %arg5[%c0_10, %c0_11] : memref<8x128xf32, #tpu.memory_space<vmem>>, vector<8x128xf32>
      %c0_12 = arith.constant 0 : index
      %c0_13 = arith.constant 0 : index
      %26 = vector.load %arg4[%c0_12, %c0_13] : memref<8x128xf32, #tpu.memory_space<vmem>>, vector<8x128xf32>
      tpu.vector_store %arg4[%c0_12, %c0_13], %25 {strides = array<i32>} : memref<8x128xf32, #tpu.memory_space<vmem>>, vector<8x128xf32>,
    } else {
    }
    return
  }
  func.func @transform_0(%arg0: i32, %arg1: i32) -> (i32, i32) {
    %c0_i32 = arith.constant 0 : i32
    %c0_i32_0 = arith.constant 0 : i32
    return %arg0, %c0_i32 : i32, i32
  }
  func.func @transform_1(%arg0: i32, %arg1: i32) -> (i32, i32) {
    %c0_i32 = arith.constant 0 : i32
    %c0_i32_0 = arith.constant 0 : i32
    return %arg1, %c0_i32 : i32, i32
  }
  func.func @transform_2(%arg0: i32, %arg1: i32) -> (i32, i32) {
    %c0_i32 = arith.constant 0 : i32
    %c0_i32_0 = arith.constant 0 : i32
    return %arg0, %c0_i32 : i32, i32
  }
}

</mosaic_0001>

<bundles_post_ra>
// kernel: tt_embedding_forward.1
= control target key start
LH: loop header
LB: loop body
LE: loop exit
PB: predicated region body
PF: predicated region fallthrough
CT: control target
= control target key end

     0   :  { %7 = vsyncpa [#allocation4], 0  ;;  %s697_s0 = inlined_call_operand.vmem [shape: s32[16,1], index: 0, kind: input, shape index: {}]   ;;  %s698_s1 = inlined_call_operand.vmem [shape: bf16[64,128], index: 1, kind: input, shape index: {}]   ;;  %s699_s2 = inlined_call_operand.hbm [shape: f32[16,128], index: 2, kind: output, shape index: {}]  }
   0x1   :  { %9 = vsyncpa [#allocation4 + $0x1], 0  ;;  %s574_s9 = smov 0   ;;  %s576_s10 = smov 0  }
   0x2   :  { %s578_s11 = smov 0   ;;  %s580_s12 = smov 0  }
   0x3   :  { %s582_s13 = smov 0   ;;  %s584_s14 = smov 0  }
   0x4 LB: > { %s379_s15 = sadd.s32 4294967295, %s553_s14   ;;  %s380_s16 = sadd.s32 4294967294, %s553_s14   ;;  %s553_s14 = sphi %s584_s14, %s15_s14   ;;  %s549_s13 = sphi %s582_s13, %s706_s13   ;;  %s545_s12 = sphi %s580_s12, %s705_s12   ;;  %s541_s11 = sphi %s578_s11, %s704_s11   ;;  %s537_s10 = sphi %s576_s10, %s703_s10   ;;  %s533_s9 = sphi %s574_s9, %s702_s9  }
   0x5   : > { %s27_s17 = sadd.s32 1, %s549_s13  ;;  %s86_s18 = sadd.s32 1, %s541_s11 }
   0x6   : > { %p29_p0 = scmp.ge.s32.totalorder %s27_s17, 2  ;;  %p96_p1 = scmp.ne.s32.totalorder %s541_s11, %s537_s10 }
   0x7   : > { %p97_p2 = scmp.eq.s32.totalorder %s379_s15, 1  ;;  %p102_p3 = scmp.ne.s32.totalorder %s537_s10, %s533_s9 }
   0x8   : > { %s708_s17 = smov (%p29_p0, %s27_s17), 0  ;;  %p103_p5 = scmp.eq.s32.totalorder %s380_s16, 1 }
   0x9   : > { %p614_p4 = por %p97_p2, %p96_p1  ;;  %s83_s20 = ssub.s32 %s549_s13, %s708_s17 }
   0xa   : > { %p384_p6 = scmp.ge.s32.totalorder %s553_s14, 1  ;;  %p84_p7 = scmp.eq.s32.totalorder %s83_s20, 0 }
   0xb   : > { %p621_p8 = por %p103_p5, %p102_p3  ;;  %p137_p9 = scmp.lt.s32.totalorder %s553_s14, 3 }
   0xc   : > { %s627_s22 = scalar_select %p84_p7, %s541_s11, %s86_s18  }
   0xd   : > { %p138_p10 = pnand %p384_p6, %p137_p9 }
   0xe   : > { %p163_p11 = scmp.lt.s32.totalorder (!%p138_p10), %s545_s12, 1  ;;  %s160_s8 = sand.u32 (!%p138_p10), 1, %s537_s10  }
   0xf   : > { %141 = sbr.rel (%p138_p10) target bundleno = 367 (0x16f), region = 28  ;;  %s385_s15 = sshll.u32 (!%p138_p10), %s160_s8, 3 }
  0x10   : > { %s162_s16 = scalar_lea.vmem (!%p138_p10), [#allocation3], %s385_s15  ;;  %s394_s20 = sshll.u32 (!%p138_p10), %s545_s12, 7 }
  0x11   : > { %s297_s18 = sshll.u32 (!%p138_p10), %s162_s16, 4  ;;  %s284_s26 = scalar_lea.sflag (!%p138_p10), [#allocation4], %s160_s8  ;;  %s648_s18 = int_to_ptr.vmem [resolvable:$true] %s297_s18 }
  0x12   : > { %s477_s27 = scalar_lea.vmem (!%p138_p10), %s648_s18, 128 }
  0x13   : > { %p478_p12 = scmp.ne.s32.totalorder (!%p138_p10), %s648_s18, %s477_s27 }
  0x14   : > { %v473_v0 = vld [vmem:[%s698_s1 + $0x18] sm:$0xff]   ;;  %v555_v1 = vmov 0   ;;  %v556_v2 = vmov 0.0   ;;  %s164_s25 = scalar_select %p163_p11, %s545_s12, 1  ;;  %v474_v3 = vld [vmem:[%s698_s1 + $0x10] sm:$0xff]   ;;  %v475_v5 = vld [vmem:[%s698_s1 + $0x8] sm:$0xff]   ;;  %v181_v8 = vlaneseq }
  0x15   : > { %472 = vset.pattern.permute.xlu0 %v555_v1  ;;  %402 = vmatprep.subr.bf16.mxu0 %v556_v2  ;;  %v476_v7 = vld [vmem:[%s698_s1] sm:$0xff]   ;;  %vm557_vm1 = vmmov 0   ;;  %vm232_vm5 = vcmask 523264   ;;  %p479_p13 = pnand %p478_p12, %p614_p4  ;;  %s558_s12 = smov [#allocation3]  }
  0x16   : > { %403 = vmatpush3.bf16.msra.mxu0 %v473_v0  ;;  %s386_s28 = sshll.u32 %s164_s25, 3  ;;  %410 = vmatprep.mubr.msk.bf16.mxu0 %vm557_vm1, %v556_v2  ;;  %v182_v10 = vand.u32 127, %v181_v8  ;;  %s653_s25 = scalar_lea.hbm %s699_s2, %s394_s20 }
  0x17   : > { %404 = vmatprep.subr.bf16.mxu0 %v556_v2  ;;  %s166_s3 = scalar_lea.vmem %s697_s0, %s386_s28  ;;  %p480_p0 = pneg %p479_p13 }
  0x18   : > { %v179_v4 = vld [vmem:[%s166_s3] sm:$0xff]  ;;  %s481_s28 = sshll.u32 %s558_s12, 4  ;;  %s482_s28 = int_to_ptr.vmem [resolvable:$false] %s481_s28 }
  0x19   : > { %186 = vperm.xlu0 %472, %v179_v4   ;;  %vm189_vm0 = vcmp.ne.s32.totalorder %v179_v4, 3  ;;  %s483_s29 = scalar_lea.vmem %s482_s28, 256  ;;  %p484_p1 = scmp.lt.s32.totalorder %s648_s18, %s482_s28 }
  0x1a   : > { %405 = vmatpush3.bf16.msra.mxu0 %v474_v3  ;;  %v190_v6 = vsel %vm189_vm0, 1, %v555_v1  ;;  %p485_p2 = scmp.lt.s32.totalorder %s483_s29, %s477_s27 }
  0x1b   : > { %406 = vmatprep.subr.bf16.mxu0 %v556_v2 }
  0x1c   : > { %p486_p3 = por %p485_p2, %p484_p1 }
  0x1d   : > { %192 = vperm.xlu0 %472, %v190_v6  }
  0x1e   : > { %407 = vmatpush3.bf16.msra.mxu0 %v475_v5  ;;  %p487_p5 = pnand %p486_p3, %p480_p0 }
  0x1f   : > { %408 = vmatprep.subr.bf16.mxu0 %v556_v2 }
  0x22   : > { %409 = vmatpush3.bf16.msra.mxu0 %v476_v7 }
  0x94   : > { %v187_v9 = vpop.permute.xlu0 %186 }
  0x95   : > { %vm188_vm2 = vcmp.eq.s32.totalorder %v182_v10, %v187_v9 }
  0x98   : > { %v193_v11 = vpop.permute.xlu0 %192 }
  0x99   : > { %vm194_vm3 = vcmp.eq.s32.totalorder %v193_v11, 1 }
  0x9a   : > { %vm195_vm4 = vmand %vm188_vm2, %vm194_vm3 }
  0x9b   : > { %v387_v12 = vsel %vm195_vm4, 1.0, %v556_v2 }
  0x9c   : > { %v198_v13 = vpack.c.bf16 %v387_v12, %v387_v12 }
  0x9e   : > { %411 = vmatmul.mubr.msk.bf16.vlgmr.msra.gmra.mxu0 %vm232_vm5, %v198_v13 }
 0x15e   : > { %v270_v14 = vpop.f32.mrf.mxu0 }
 0x15f   : > { %282 = vst [vmem:[%s162_s16] sm:$0xff] %v270_v14 }
 0x160   : > { %v412_v15 = vpop.f32.mrf.mxu0 }
 0x161   : > { %490 = shalt.err (!%p487_p5)
}
 0x162   : > { %s491_s30 = scalar_lea.hbm %s653_s25, 128  ;;  %s495_s5 = scalar_lea.hbm %s699_s2, 256 }
 0x163   : > { %p492_p6 = scmp.ne.s32.totalorder %s653_s25, %s491_s30  ;;  %p496_p10 = scmp.lt.s32.totalorder %s653_s25, %s699_s2 }
 0x164   : > { %p497_p11 = scmp.lt.s32.totalorder %s495_s5, %s491_s30 }
 0x165   : > { %p493_p7 = pnand %p492_p6, %p614_p4 }
 0x166   : > { %p498_p12 = por %p497_p11, %p496_p10 }
 0x167   : > { %p494_p9 = pneg %p493_p7 }
 0x169   : > { %p499_p13 = pnand %p498_p12, %p494_p9 }
 0x16b   : > { %502 = shalt.err (!%p499_p13)
}
 0x16c   : > { %414 = dma.vmem_to_hbm [thread:$0]  (%p614_p4), %s648_s18, 128, %s653_s25, %s284_s26   ;;  %v273_v16 = vpop.f32.mrf.mxu0 }
 0x16e   : > { %v413_v17 = vpop.f32.mrf.mxu0 }
 0x16f PF: > { %p420_p0 = scmp.ge.s32.totalorder %s553_s14, 2  ;;  %s309_s8 = sand.u32 1, %s533_s9  }
 0x170   : > { %s310_s15 = scalar_lea.sflag [#allocation4], %s309_s8 }
 0x171   : > { %p417_p1 = pnand %p420_p0, %p621_p8 }
 0x173   : > { %p418_p2 = pneg %p417_p1 }
 0x175   : > { %528 = dma.done.wait (%p418_p2), %s310_s15, 128  }
 0x176   : > { %530 = vsyncadd (%p418_p2), %s310_s15, 4294967168  ;;  %s15_s14 = sadd.s32 1, %s553_s14   ;;  %s702_s9 = smov %s537_s10 }
 0x177   : > { %p12_p3 = scmp.ge.s32.totalorder %s15_s14, 4   ;;  %s703_s10 = smov %s541_s11 }
 0x178   : > { %s704_s11 = smov %s627_s22  ;;  %s705_s12 = smov %s549_s13 }
 0x179   : > { %s706_s13 = smov %s708_s17  ;;  %14 = sbr.rel (!%p12_p3) target bundleno = 4 (0x4), region = 74 }
 0x17e   :  { %315 = vsyncpa [#allocation4], 1 }
 0x17f   :  { %317 = vsyncpa [#allocation4 + $0x1], 1 }

</bundles_post_ra>
